<compile_context>
chip_gen: v6e
topology: v6e:2x2x1
jax: 0.10.0
libtpu: 0.0.40
codegen_flags: <defaults>
</compile_context>

<pallas_src>
import functools

import jax
import jax.numpy as jnp
from jax.experimental import pallas as pl
from jax.experimental.pallas import tpu as pltpu


def _patch_embed_kernel(p_ref, w_ref, cls_ref, bpp_ref, o_ref, *, bt, n, d):
    # p_ref  : (bt*n, IN)   flattened patch rows for bt images
    # w_ref  : (IN, d)      linear weight, already transposed (in_dim x n_model)
    # cls_ref: (bt, 1, d)   class_label + pos_embed   (folded in wrapper)
    # bpp_ref: (bt, 1, d)   bias + pos_embed          (folded in wrapper)
    # o_ref  : (bt, n+1, d) output embeddings
    proj = jnp.dot(p_ref[...], w_ref[...],
                   preferred_element_type=jnp.float32)       # (bt*n, d) on MXU
    proj = proj.reshape(bt, n, d) + bpp_ref[...]             # broadcast over n
    # Direct stores (no concatenate -> no extra full-tile VMEM copy).
    o_ref[:, pl.ds(0, 1), :] = cls_ref[...].astype(o_ref.dtype)
    o_ref[:, pl.ds(1, n), :] = proj.astype(o_ref.dtype)


def _choose_batch_block(batch, n_patches, in_dim, d_model,
                        target_rows=1024,
                        vmem_budget_bytes=36 * 1024 * 1024):
    """Pick Bt: big matmul blocks, >=2 grid steps, within a VMEM budget."""
    bt = max(1, min(batch, target_rows // max(1, n_patches)))
    if batch >= 2:
        # Keep at least 2 grid steps so the "parallel" axis can shard across
        # the two v7x TensorCores (harmless on single-TC v5e/v6e).
        bt = min(bt, pl.cdiv(batch, 2))

    def vmem_bytes(b):
        itemsize = 4
        per_step = (b * n_patches * in_dim            # patch block
                    + b * (n_patches + 1) * d_model   # output block
                    + 2 * b * d_model)                # cls + bias/pos blocks
        # double-buffered blocks + (double-buffered) weight tile
        return itemsize * (2 * per_step + 2 * in_dim * d_model)

    while bt > 1 and vmem_bytes(bt) > vmem_budget_bytes:
        bt -= 1
    return bt


def patch_embedding(x, weight_t, bias, class_label, pos_embed, patch_size):
    """x: (B, C, H, W) float32. Returns (B, N+1, n_model) float32."""
    B, C, H, W = x.shape
    P = patch_size
    h, w = H // P, W // P
    N = h * w
    IN = P * P * C
    D = weight_t.shape[1]

    # einops: 'b c (h h1) (w w1) -> b (h w) (h1 w1 c)', flattened to matmul rows.
    patches = x.reshape(B, C, h, P, w, P).transpose(0, 2, 4, 3, 5, 1)
    patches = patches.reshape(B * N, IN).astype(jnp.float32)

    # Fold the adds outside the hot loop: one (B,1,D) operand each.
    cls_plus_pos = (class_label + pos_embed).astype(jnp.float32)            # (B,1,D)
    bias_plus_pos = (bias.reshape(1, 1, D) + pos_embed).astype(jnp.float32)  # (B,1,D)

    Bt = _choose_batch_block(B, N, IN, D)
    n_blocks = pl.cdiv(B, Bt)
    B_pad = n_blocks * Bt
    if B_pad != B:
        pad = B_pad - B
        patches = jnp.concatenate(
            [patches, jnp.zeros((pad * N, IN), jnp.float32)], axis=0)
        cls_plus_pos = jnp.concatenate(
            [cls_plus_pos, jnp.zeros((pad, 1, D), jnp.float32)], axis=0)
        bias_plus_pos = jnp.concatenate(
            [bias_plus_pos, jnp.zeros((pad, 1, D), jnp.float32)], axis=0)

    itemsize = 4
    cost = pl.CostEstimate(
        flops=2 * B_pad * N * IN * D,
        transcendentals=0,
        bytes_accessed=itemsize * (B_pad * N * IN + IN * D
                                   + B_pad * (N + 1) * D + 2 * B_pad * D),
    )

    kernel = functools.partial(_patch_embed_kernel, bt=Bt, n=N, d=D)

    out = pl.pallas_call(
        kernel,
        out_shape=jax.ShapeDtypeStruct((B_pad, N + 1, D), jnp.float32),
        grid_spec=pltpu.PrefetchScalarGridSpec(
            num_scalar_prefetch=0,
            grid=(n_blocks,),
            in_specs=[
                pl.BlockSpec((Bt * N, IN), lambda b: (b, 0)),
                # Constant block index across the grid -> Pallas skips the
                # re-fetch.  (pipeline_mode=pl.Buffered(1) would also free the
                # second weight buffer; omitted as the weight tile is small.)
                pl.BlockSpec((IN, D), lambda b: (0, 0)),
                pl.BlockSpec((Bt, 1, D), lambda b: (b, 0, 0)),
                pl.BlockSpec((Bt, 1, D), lambda b: (b, 0, 0)),
            ],
            out_specs=pl.BlockSpec((Bt, N + 1, D), lambda b: (b, 0, 0)),
        ),
        compiler_params=pltpu.CompilerParams(
            dimension_semantics=("parallel",),
            vmem_limit_bytes=48 * 1024 * 1024,
        ),
        cost_estimate=cost,
    )(patches, weight_t.astype(jnp.float32), cls_plus_pos, bias_plus_pos)
    return out[:B]


def _reference(x, weight_t, bias, class_label, pos_embed, patch_size):
    B, C, H, W = x.shape
    P = patch_size
    h, w = H // P, W // P
    patches = x.reshape(B, C, h, P, w, P).transpose(0, 2, 4, 3, 5, 1)
    patches = patches.reshape(B, h * w, P * P * C)
    proj = patches @ weight_t + bias                       # (B, N, D)
    proj = jnp.concatenate([class_label, proj], axis=1)    # (B, N+1, D)
    return proj + pos_embed                                # broadcast over seq


if __name__ == "__main__":
    # Small, self-consistent shapes.
    BATCH = 2
    CHANNELS = 4
    IMG = 16
    PATCH = 4
    N_MODEL = 128
    INPUT_SIZE = PATCH * PATCH * CHANNELS       # 64
    N_PATCHES = (IMG // PATCH) ** 2             # 16

    key = jax.random.PRNGKey(0)
    kx, kw, kb, kc, kp = jax.random.split(key, 5)

    x = jax.random.normal(kx, (BATCH, CHANNELS, IMG, IMG), dtype=jnp.float32)
    # nn.Linear(in, out): weight is (out, in); we store the transpose (in, out).
    weight_t = (jax.random.normal(kw, (INPUT_SIZE, N_MODEL), dtype=jnp.float32)
                * (1.0 / jnp.sqrt(INPUT_SIZE)))
    bias = jax.random.normal(kb, (N_MODEL,), dtype=jnp.float32) * 0.01
    class_label = jax.random.normal(kc, (BATCH, 1, N_MODEL), dtype=jnp.float32)
    pos_embed = jax.random.normal(kp, (BATCH, 1, N_MODEL), dtype=jnp.float32)

    out = patch_embedding(x, weight_t, bias, class_label, pos_embed, PATCH)
    out = jax.block_until_ready(out)

    ref = _reference(x, weight_t, bias, class_label, pos_embed, PATCH)
    assert out.shape == (BATCH, N_PATCHES + 1, N_MODEL), out.shape
    assert jnp.allclose(out, ref, atol=2e-4, rtol=2e-4), \
        float(jnp.max(jnp.abs(out - ref)))

    print("KERNEL_OK")
</pallas_src>

<mosaic_0001>
module attributes {stable_mosaic.version = 11 : i64} {
  func.func @_patch_embed_kernel(%arg0: i32, %arg1: memref<16x64xf32, #tpu.memory_space<vmem>>, %arg2: memref<64x128xf32, #tpu.memory_space<vmem>>, %arg3: memref<1x1x128xf32, #tpu.memory_space<vmem>>, %arg4: memref<1x1x128xf32, #tpu.memory_space<vmem>>, %arg5: memref<1x17x128xf32, #tpu.memory_space<vmem>>) attributes {dimension_semantics = [#tpu.dimension_semantics<parallel>], iteration_bounds = array<i64: 2>, scalar_prefetch = 0 : i64, scratch_operands = 0 : i64, tpu.core_type = #tpu.core_type<tc>, window_params = [{transform_indices = @transform_0, window_bounds = array<i64: 16, 64>}, {pipeline_mode = #tpu.pipeline_mode<synchronous>, transform_indices = @transform_1, window_bounds = array<i64: 64, 128>}, {transform_indices = @transform_2, window_bounds = array<i64: 1, 1, 128>}, {transform_indices = @transform_3, window_bounds = array<i64: 1, 1, 128>}, {transform_indices = @transform_4, window_bounds = array<i64: 1, 17, 128>}]} {
    %c0 = arith.constant 0 : index
    %c0_0 = arith.constant 0 : index
    %0 = vector.load %arg1[%c0, %c0_0] : memref<16x64xf32, #tpu.memory_space<vmem>>, vector<16x64xf32>
    %c0_1 = arith.constant 0 : index
    %c0_2 = arith.constant 0 : index
    %1 = vector.load %arg2[%c0_1, %c0_2] : memref<64x128xf32, #tpu.memory_space<vmem>>, vector<64x128xf32>
    %cst = arith.constant dense<0.000000e+00> : vector<16x128xf32>
    %2 = tpu.matmul %0, %1, %cst {dimension_numbers = #tpu.dot_dimension_numbers<[1], [0], [0], [1], [0, 0, 1, 1], [], []>} : vector<16x64xf32>, vector<64x128xf32>, vector<16x128xf32> -> vector<16x128xf32>
    %3 = vector.shape_cast %2 : vector<16x128xf32> to vector<1x16x128xf32>
    %c0_3 = arith.constant 0 : index
    %c0_4 = arith.constant 0 : index
    %c0_5 = arith.constant 0 : index
    %4 = vector.load %arg4[%c0_3, %c0_4, %c0_5] : memref<1x1x128xf32, #tpu.memory_space<vmem>>, vector<1x1x128xf32>
    %5 = vector.broadcast %4 : vector<1x1x128xf32> to vector<1x16x128xf32>
    %6 = arith.addf %3, %5 : vector<1x16x128xf32>
    %c0_6 = arith.constant 0 : index
    %c0_7 = arith.constant 0 : index
    %c0_8 = arith.constant 0 : index
    %7 = vector.load %arg3[%c0_6, %c0_7, %c0_8] : memref<1x1x128xf32, #tpu.memory_space<vmem>>, vector<1x1x128xf32>
    %c0_9 = arith.constant 0 : index
    %c0_10 = arith.constant 0 : index
    %c0_11 = arith.constant 0 : index
    %8 = vector.load %arg5[%c0_9, %c0_10, %c0_11] : memref<1x17x128xf32, #tpu.memory_space<vmem>>, vector<1x1x128xf32>
    tpu.vector_store %arg5[%c0_9, %c0_10, %c0_11], %7 {strides = array<i32>} : memref<1x17x128xf32, #tpu.memory_space<vmem>>, vector<1x1x128xf32>,
    %c0_12 = arith.constant 0 : index
    %c1 = arith.constant 1 : index
    %c0_13 = arith.constant 0 : index
    %9 = vector.load %arg5[%c0_12, %c1, %c0_13] : memref<1x17x128xf32, #tpu.memory_space<vmem>>, vector<1x16x128xf32>
    tpu.vector_store %arg5[%c0_12, %c1, %c0_13], %6 {strides = array<i32>} : memref<1x17x128xf32, #tpu.memory_space<vmem>>, vector<1x16x128xf32>,
    return
  }
  func.func @transform_0(%arg0: i32) -> (i32, i32) {
    %c0_i32 = arith.constant 0 : i32
    %c0_i32_0 = arith.constant 0 : i32
    return %arg0, %c0_i32 : i32, i32
  }
  func.func @transform_1(%arg0: i32) -> (i32, i32) {
    %c0_i32 = arith.constant 0 : i32
    %c0_i32_0 = arith.constant 0 : i32
    %c0_i32_1 = arith.constant 0 : i32
    return %c0_i32, %c0_i32_0 : i32, i32
  }
  func.func @transform_2(%arg0: i32) -> (i32, i32, i32) {
    %c0_i32 = arith.constant 0 : i32
    %c0_i32_0 = arith.constant 0 : i32
    %c0_i32_1 = arith.constant 0 : i32
    return %arg0, %c0_i32, %c0_i32_0 : i32, i32, i32
  }
  func.func @transform_3(%arg0: i32) -> (i32, i32, i32) {
    %c0_i32 = arith.constant 0 : i32
    %c0_i32_0 = arith.constant 0 : i32
    %c0_i32_1 = arith.constant 0 : i32
    return %arg0, %c0_i32, %c0_i32_0 : i32, i32, i32
  }
  func.func @transform_4(%arg0: i32) -> (i32, i32, i32) {
    %c0_i32 = arith.constant 0 : i32
    %c0_i32_0 = arith.constant 0 : i32
    %c0_i32_1 = arith.constant 0 : i32
    return %arg0, %c0_i32, %c0_i32_0 : i32, i32, i32
  }
}

</mosaic_0001>

<bundles_post_ra>
// kernel: tpu_custom_call.1
= control target key start
LH: loop header
LB: loop body
LE: loop exit
PB: predicated region body
PF: predicated region fallthrough
CT: control target
= control target key end

     0   :  { %9 = vsyncpa [#allocation3], 0  ;;  %s827_s0 = inlined_call_operand.hbm [shape: f32[32,64], index: 0, kind: input, shape index: {}]   ;;  %s828_s1 = inlined_call_operand.hbm [shape: f32[64,128], index: 1, kind: input, shape index: {}]   ;;  %s829_s2 = inlined_call_operand.vmem [shape: f32[2,1,128], index: 2, kind: input, shape index: {}]   ;;  %s830_s3 = inlined_call_operand.vmem [shape: f32[2,1,128], index: 3, kind: input, shape index: {}]   ;;  %s831_s4 = inlined_call_operand.vmem [shape: f32[2,17,128], index: 4, kind: output, shape index: {}]  }
   0x1   :  { %11 = vsyncpa [#allocation3 + $0x1], 0 }
   0x2   :  { %12 = vsyncpa [#allocation5], 0  ;;  %s684_s15 = smov 0   ;;  %s686_s16 = smov 0  }
   0x3   :  { %s688_s17 = smov 0   ;;  %s690_s18 = smov 0  }
   0x4 LB: > { %s703_s19 = sadd.s32 4294967295, %s653_s18   ;;  %p38_p0 = scmp.ne.s32.totalorder %s645_s16, %s641_s15  ;;  %s653_s18 = sphi %s690_s18, %s846_s18   ;;  %s649_s17 = sphi %s688_s17, %s845_s17   ;;  %s645_s16 = sphi %s686_s16, %s844_s16   ;;  %s641_s15 = sphi %s684_s15, %s843_s15  }
   0x5   : > { %p832_p1 = scmp.eq.s32.totalorder %s703_s19, 0  ;;  %p463_p2 = scmp.ge.s32.totalorder %s653_s18, 1 }
   0x6   : > { %p148_p3 = scmp.lt.s32.totalorder %s653_s18, 3  ;;  %s655_s22 = smov [#allocation4]  }
   0x7   : > { %p711_p4 = por %p832_p1, %p38_p0  ;;  %s160_s23 = sshll.u32 %s655_s22, 4  ;;  %s161_s23 = int_to_ptr.vmem [resolvable:$true] %s160_s23 }
   0x8   : > { %p715_p5 = pnand %p463_p2, %p148_p3  ;;  %s728_s25 = sadd.s32 1, %s653_s18  }
   0x9   : > { %s835_s20 = scalar_select %p711_p4, 1, 0 }
   0xa   : > { %s836_s21 = scalar_select %p715_p5, 1, 0 }
   0xb   : > { %p515_p6 = pneg %p715_p5  ;;  %s25_s26 = sadd.s32 1, %s649_s17 }
   0xc   : > { %s22_s27 = ssub.s32 %s653_s18, %s728_s25  ;;  %s572_s28 = scalar_lea.vmem %s161_s23, 1024 }
   0xd   : > { %p723_p7 = pnand %p515_p6, %p832_p1  ;;  %p573_p9 = scmp.ne.s32.totalorder %s161_s23, %s572_s28 }
   0xe   : > { %p580_p12 = scmp.lt.s32.totalorder %s161_s23, %s161_s23  ;;  %p581_p13 = scmp.lt.s32.totalorder %s572_s28, %s572_s28 }
   0xf   : > { %p563_p8 = pneg %p723_p7 }
  0x10   : > { %p582_p0 = por %p581_p13, %p580_p12 }
  0x11   : > { %p575_p10 = pnand %p573_p9, %p563_p8 }
  0x13   : > { %p576_p11 = pneg %p575_p10 }
  0x15   : > { %p583_p2 = pnand %p582_p0, %p576_p11 }
  0x17   : > { %586 = shalt.err (!%p583_p2)
}
  0x18   : > { %s656_s29 = smov 128   ;;  %s657_s30 = smov 8  }
  0x19   : > { %518 = dma.hbm_to_vmem [thread:$0]  (!%p723_p7), %s828_s1, 1024, %s161_s23, [#allocation5], %s656_s29, %s656_s29, %s657_s30  }
  0x1a   : > { %p23_p3 = scmp.eq.s32.totalorder %s22_s27, 0  ;;  %p32_p6 = scmp.ne.s32.totalorder %s649_s17, %s645_s16 }
  0x1b   : > { %p33_p8 = scmp.eq.s32.totalorder %s653_s18, 0  ;;  %p524_p9 = scmp.lt.s32.totalorder %s653_s18, 2 }
  0x1c   : > { %s748_s7 = scalar_select %p23_p3, %s649_s17, %s25_s26  }
  0x1d   : > { %p34_p10 = por %p33_p8, %p32_p6  ;;  %s174_s8 = sand.u32 1, %s649_s17  }
  0x1e   : > { %s466_s9 = sshll.u32 %s174_s8, 4  ;;  %s478_s10 = sshll.u32 %s653_s18, 8 }
  0x1f   : > { %s755_s13 = scalar_lea.hbm %s827_s0, %s478_s10  ;;  %s178_s14 = scalar_lea.vmem [#allocation2], %s466_s9 }
  0x20   : > { %s185_s15 = sshll.u32 %s178_s14, 4  ;;  %p759_p7 = pnand %p524_p9, %p34_p10  ;;  %s757_s15 = int_to_ptr.vmem [resolvable:$true] %s185_s15 }
  0x21   : > { %s763_s23 = scalar_lea.sflag [#allocation3], %s174_s8  ;;  %s587_s18 = scalar_lea.hbm %s755_s13, 256 }
  0x22   : > { %p588_p11 = scmp.ne.s32.totalorder %s755_s13, %s587_s18  ;;  %p589_p12 = pneg %p759_p7 }
  0x23   : > { %s592_s27 = scalar_lea.hbm %s827_s0, 512  ;;  %p593_p2 = scmp.lt.s32.totalorder %s755_s13, %s827_s0 }
  0x24   : > { %p590_p13 = pnand %p589_p12, %p588_p11  ;;  %p594_p3 = scmp.lt.s32.totalorder %s592_s27, %s587_s18 }
  0x26   : > { %p591_p0 = pneg %p590_p13  ;;  %p595_p6 = por %p594_p3, %p593_p2 }
  0x28   : > { %p596_p8 = pnand %p595_p6, %p591_p0 }
  0x2a   : > { %599 = shalt.err (!%p596_p8)
}
  0x2b   : > { %s600_s6 = scalar_lea.vmem %s757_s15, 256  ;;  %s658_s8 = smov [#allocation2]  }
  0x2c   : > { %p601_p9 = scmp.ne.s32.totalorder %s757_s15, %s600_s6  ;;  %s605_s9 = sshll.u32 %s658_s8, 4  ;;  %s606_s9 = int_to_ptr.vmem [resolvable:$false] %s605_s9 }
  0x2d   : > { %s607_s10 = scalar_lea.vmem %s606_s9, 512  ;;  %p608_p13 = scmp.lt.s32.totalorder %s757_s15, %s606_s9 }
  0x2e   : > { %p603_p10 = pnand %p601_p9, %p589_p12  ;;  %p609_p1 = scmp.lt.s32.totalorder %s607_s10, %s600_s6 }
  0x30   : > { %p604_p11 = pneg %p603_p10  ;;  %p610_p4 = por %p609_p1, %p608_p13 }
  0x32   : > { %p611_p5 = pnand %p610_p4, %p604_p11 }
  0x34   : > { %614 = shalt.err (!%p611_p5)
}
  0x35   : > { %522 = dma.hbm_to_vmem [thread:$0]  (!%p759_p7), %s755_s13, 256, %s757_s15, %s763_s23, %s656_s29, %s656_s29, %s657_s30  }
  0x36   : > { %p839_p12 = scmp.ne.s32.totalorder %s836_s21, 0 }
  0x37   : > { %s211_s11 = sand.u32 (!%p839_p12), 1, %s645_s16   ;;  %p840_p1 = scmp.ne.s32.totalorder (!%p839_p12), %s835_s20, 0 }
  0x38   : > { %209 = sbr.rel (%p839_p12) target bundleno = 280 (0x118), region = 36  ;;  %s790_s12 = sshll.u32 (!%p839_p12), %s211_s11, 4 }
  0x39   : > { %s212_s14 = scalar_lea.sflag (!%p839_p12), [#allocation3], %s211_s11  ;;  %s215_s18 = scalar_lea.vmem (!%p839_p12), [#allocation2], %s790_s12 }
  0x3d   : > { %632 = dma.done.wait (%p840_p1), %s212_s14, 256  }
  0x3e   : > { %634 = vsyncadd (%p840_p1), %s212_s14, 4294967040  ;;  %p841_p4 = scmp.eq.s32.totalorder %s703_s19, 0 }
  0x40   : > { %636 = dma.done.wait (%p841_p4), [#allocation5], 1024   ;;  %p842_p5 = pmov %p841_p4 }
  0x41   : > { %v271_v0 = vld [vmem:[#allocation4 + $0x38] sm:$0xff]  ;;  %v270_v1 = vld [vmem:[#allocation4 + $0x30] sm:$0xff]  ;;  %vm272_vm0 = vcmask 523264   ;;  %v269_v2 = vld [vmem:[#allocation4 + $0x28] sm:$0xff]  ;;  %p251_p7 = scmp.lt.s32.totalorder %s703_s19, 1 }
  0x42   : > { %638 = vsyncadd (%p842_p5), [#allocation5], 4294966272  ;;  %489 = vmatprep.subr.mxu0 %v271_v0  ;;  %v262_v3 = vld [vmem:[%s215_s18] sm:$0xff]  ;;  %v267_v5 = vld [vmem:[#allocation4 + $0x18] sm:$0xff] }
  0x43   : > { %490 = vmatpush3.msra.mxu0 %v271_v0  ;;  %505 = vmatprep.mubr.msk.f32.mxu0 %vm272_vm0, %v262_v3  ;;  %v268_v4 = vld [vmem:[#allocation4 + $0x20] sm:$0xff]  ;;  %v266_v6 = vld [vmem:[#allocation4 + $0x10] sm:$0xff]  ;;  %v265_v7 = vld [vmem:[#allocation4 + $0x8] sm:$0xff]  ;;  %s848_s19 = smov (!%p251_p7, %s703_s19), 1 }
  0x44   : > { %491 = vmatprep.subr.mxu0 %v270_v1  ;;  %v264_v8 = vld [vmem:[#allocation4] sm:$0xff]  ;;  %v263_v9 = vld [vmem:[%s215_s18 + $0x8] sm:$0xff]  ;;  %s508_s20 = smul.u32 24, %s848_s19  ;;  %s253_s30 = scalar_lea.vmem %s829_s2, %s848_s19 }
  0x45   : > { %492 = vmatpush3.msra.mxu0 %v270_v1  ;;  %v363_v10 = vld [vmem:[%s253_s30] sm:$0x1]  ;;  %s256_s26 = scalar_lea.vmem %s830_s3, %s848_s19 }
  0x46   : > { %493 = vmatprep.subr.mxu0 %v269_v2  ;;  %s261_s22 = scalar_lea.vmem %s831_s4, %s508_s20  ;;  %v475_v11 = vld [vmem:[%s256_s26] ss:$0 sm:$0xff] }
  0x47   : > { %494 = vmatpush3.msra.mxu0 %v269_v2  ;;  %364 = vst [vmem:[%s261_s22] sm:$0x1] %v363_v10 }
  0x48   : > { %495 = vmatprep.subr.mxu0 %v268_v4 }
  0x49   : > { %496 = vmatpush3.msra.mxu0 %v268_v4 }
  0x4a   : > { %497 = vmatprep.subr.mxu0 %v267_v5 }
  0x4b   : > { %498 = vmatpush3.msra.mxu0 %v267_v5 }
  0x4c   : > { %499 = vmatprep.subr.mxu0 %v266_v6 }
  0x4d   : > { %500 = vmatpush3.msra.mxu0 %v266_v6 }
  0x4e   : > { %501 = vmatprep.subr.mxu0 %v265_v7 }
  0x4f   : > { %502 = vmatpush3.msra.mxu0 %v265_v7 }
  0x50   : > { %503 = vmatprep.subr.mxu0 %v264_v8 }
  0x51   : > { %504 = vmatpush3.msra.mxu0 %v264_v8 }
  0x52   : > { %506 = vmatmul.mubr.msk.f32.vlgmr.msra.gmra.mxu0 %vm272_vm0, %v263_v9 }
 0x112   : > { %v507_v12 = vpop.f32.mrf.mxu0 }
 0x113   : > { %v362_v13 = vadd.f32 %v507_v12, %v475_v11 }
 0x114   : > { %v345_v14 = vpop.f32.mrf.mxu0 }
 0x115   : > { %366 = vst [vmem:[%s261_s22 + $0x9] sm:$0xff] %v362_v13  ;;  %v361_v15 = vadd.f32 %v475_v11, %v345_v14 }
 0x117   : > { %365 = vst [vmem:[%s261_s22 + $0x1] sm:$0xff] %v361_v15 }
 0x118 PF: > { %p15_p0 = scmp.ge.s32.totalorder %s728_s25, 4   ;;  %s843_s15 = smov %s645_s16 }
 0x119   : > { %s844_s16 = smov %s649_s17  ;;  %s845_s17 = smov %s748_s7 }
 0x11a   : > { %s846_s18 = smov %s728_s25  ;;  %17 = sbr.rel (!%p15_p0) target bundleno = 4 (0x4), region = 86 }
 0x11f   :  { %388 = vsyncpa [#allocation3], 1 }
 0x120   :  { %390 = vsyncpa [#allocation3 + $0x1], 1 }
 0x121   :  { %391 = vsyncpa [#allocation5], 1 }

</bundles_post_ra>
